<compile_context>
chip_gen: v6e
topology: v6e:2x2x1
jax: 0.10.0
libtpu: 0.0.40
codegen_flags: <defaults>
</compile_context>

<pallas_src>
import functools

import jax
import jax.numpy as jnp
from jax.experimental import pallas as pl
from jax.experimental.pallas import tpu as pltpu


_TARGET_BLOCK_BYTES = 2 * 1024 * 1024  # ~2 MiB input block per grid step


def _pair(v):
    if isinstance(v, (tuple, list)):
        assert len(v) == 2
        return int(v[0]), int(v[1])
    return int(v), int(v)


def _maxpool_kernel(x_ref, o_ref, t_ref, *, kh, kw, sh, sw, dh, dw, ho, wo):
    # x_ref: (tile_r, Hp, Wp)   o_ref: (tile_r, ho, wo)   t_ref: (tile_r, Wp, ho)

    def _rows(ref, start, size, stride):
        # Strided window read along the second-to-last (sublane) axis.
        if stride == 1:
            return ref[:, pl.ds(start, size), :]
        return ref[:, pl.ds(start, size, stride=stride), :]

    # ---- pool along H (sublane-strided loads straight from the input tile) ----
    h_max = _rows(x_ref, 0, ho, sh)
    for di in range(1, kh):
        h_max = jnp.maximum(h_max, _rows(x_ref, di * dh, ho, sh))

    # ---- swap H<->W so W becomes the sublane axis, stage in VMEM scratch ----
    t_ref[...] = jnp.swapaxes(h_max, -1, -2)            # (tile_r, Wp, ho)

    # ---- pool along W ----
    w_max = _rows(t_ref, 0, wo, sw)
    for dj in range(1, kw):
        w_max = jnp.maximum(w_max, _rows(t_ref, dj * dw, wo, sw))

    o_ref[...] = jnp.swapaxes(w_max, -1, -2).astype(o_ref.dtype)


def maxpool2d_forward(x, kernel_size, stride=None, padding=0, dilation=1):
    """MaxPool2d forward on NCHW (or CHW) input, matching torch.nn.MaxPool2d."""
    kh, kw = _pair(kernel_size)
    sh, sw = _pair(stride) if stride is not None else (kh, kw)
    ph, pw = _pair(padding)
    dh, dw = _pair(dilation)

    squeeze_batch = x.ndim == 3
    if squeeze_batch:
        x = x[None]
    N, C, H, W = x.shape

    if ph or pw:
        if jnp.issubdtype(x.dtype, jnp.floating):
            pad_val = float("-inf")
        else:
            pad_val = jnp.iinfo(x.dtype).min
        x = jnp.pad(x, ((0, 0), (0, 0), (ph, ph), (pw, pw)),
                    constant_values=pad_val)
    Hp, Wp = H + 2 * ph, W + 2 * pw

    Ho = (Hp - dh * (kh - 1) - 1) // sh + 1
    Wo = (Wp - dw * (kw - 1) - 1) // sw + 1
    assert Ho > 0 and Wo > 0, "pooling window larger than (padded) input"

    R = N * C
    xr = x.reshape(R, Hp, Wp)  # free, contiguous reshape

    # Row tile sized to ~2 MiB input blocks (multiple of 8 sublanes when possible).
    # TODO(synk): very large spatial dims (H*W per row >> block budget) would also
    # need H tiling; not needed for typical CNN shapes.
    row_bytes = Hp * Wp * x.dtype.itemsize
    tile_r = max(1, min(R, _TARGET_BLOCK_BYTES // max(row_bytes, 1)))
    if tile_r >= 8:
        tile_r -= tile_r % 8
    grid = (pl.cdiv(R, tile_r),)

    kernel = functools.partial(
        _maxpool_kernel,
        kh=kh, kw=kw, sh=sh, sw=sw, dh=dh, dw=dw, ho=Ho, wo=Wo)

    out_bytes = R * Ho * Wo * x.dtype.itemsize
    out = pl.pallas_call(
        kernel,
        out_shape=jax.ShapeDtypeStruct((R, Ho, Wo), x.dtype),
        grid_spec=pltpu.PrefetchScalarGridSpec(
            num_scalar_prefetch=0,
            grid=grid,
            in_specs=[pl.BlockSpec((tile_r, Hp, Wp), lambda i: (i, 0, 0))],
            out_specs=pl.BlockSpec((tile_r, Ho, Wo), lambda i: (i, 0, 0)),
            scratch_shapes=[pltpu.VMEM((tile_r, Wp, Ho), x.dtype)],
        ),
        compiler_params=pltpu.CompilerParams(
            dimension_semantics=("parallel",),
        ),
        cost_estimate=pl.CostEstimate(
            flops=int(R * Ho * Wo * kh * kw),
            transcendentals=0,
            bytes_accessed=int(xr.size * x.dtype.itemsize + out_bytes),
        ),
    )(xr)

    out = out.reshape(N, C, Ho, Wo)
    if squeeze_batch:
        out = out[0]
    return out


if __name__ == "__main__":
    key = jax.random.PRNGKey(0)
    k1, k2 = jax.random.split(key)

    def _ref_maxpool(x, k, s, p, d):
        kh, kw = _pair(k)
        sh, sw = _pair(s)
        ph, pw = _pair(p)
        dh, dw = _pair(d)
        return jax.lax.reduce_window(
            x,
            jnp.array(-jnp.inf, dtype=x.dtype),
            jax.lax.max,
            window_dimensions=(1, 1, kh, kw),
            window_strides=(1, 1, sh, sw),
            padding=((0, 0), (0, 0), (ph, ph), (pw, pw)),
            window_dilation=(1, 1, dh, dw),
        )

    # Case 1: module defaults -- MaxPool2d(k=2): stride=k, padding=0, dilation=1.
    x1 = jax.random.normal(k1, (2, 4, 16, 16), dtype=jnp.float32)
    out1 = jax.block_until_ready(maxpool2d_forward(x1, kernel_size=2))
    ref1 = _ref_maxpool(x1, 2, 2, 0, 1)
    assert out1.shape == ref1.shape == (2, 4, 8, 8) and out1.dtype == x1.dtype
    assert jnp.array_equal(out1, ref1)

    # Case 2: overlapping, padded windows -- MaxPool2d(k=3, s=2, p=1).
    x2 = jax.random.normal(k2, (2, 4, 16, 16), dtype=jnp.float32)
    out2 = jax.block_until_ready(
        maxpool2d_forward(x2, kernel_size=3, stride=2, padding=1))
    ref2 = _ref_maxpool(x2, 3, 2, 1, 1)
    assert out2.shape == ref2.shape == (2, 4, 8, 8) and out2.dtype == x2.dtype
    assert jnp.array_equal(out2, ref2)

    print("KERNEL_OK")
</pallas_src>

<mosaic_0001>
module attributes {stable_mosaic.version = 11 : i64} {
  func.func @_maxpool_kernel(%arg0: i32, %arg1: memref<8x16x16xf32, #tpu.memory_space<vmem>>, %arg2: memref<8x8x8xf32, #tpu.memory_space<vmem>>, %arg3: memref<8x16x8xf32, #tpu.memory_space<vmem>>) attributes {dimension_semantics = [#tpu.dimension_semantics<parallel>], iteration_bounds = array<i64: 1>, scalar_prefetch = 0 : i64, scratch_operands = 1 : i64, tpu.core_type = #tpu.core_type<tc>, window_params = [{transform_indices = @transform_0, window_bounds = array<i64: 8, 16, 16>}, {transform_indices = @transform_1, window_bounds = array<i64: 8, 8, 8>}]} {
    %c0 = arith.constant 0 : index
    %c0_0 = arith.constant 0 : index
    %c0_1 = arith.constant 0 : index
    %0 = tpu.strided_load %arg1[%c0, %c0_0, %c0_1] {strides = array<i32: 1, 2, 1>} : memref<8x16x16xf32, #tpu.memory_space<vmem>>, vector<8x8x16xf32>
    %c0_2 = arith.constant 0 : index
    %c1 = arith.constant 1 : index
    %c0_3 = arith.constant 0 : index
    %1 = tpu.strided_load %arg1[%c0_2, %c1, %c0_3] {strides = array<i32: 1, 2, 1>} : memref<8x16x16xf32, #tpu.memory_space<vmem>>, vector<8x8x16xf32>
    %2 = arith.maximumf %0, %1 : vector<8x8x16xf32>
    %3 = tpu.transpose %2, [0, 2, 1] : vector<8x8x16xf32> -> vector<8x16x8xf32>
    %c0_4 = arith.constant 0 : index
    %c0_5 = arith.constant 0 : index
    %c0_6 = arith.constant 0 : index
    %4 = vector.load %arg3[%c0_4, %c0_5, %c0_6] : memref<8x16x8xf32, #tpu.memory_space<vmem>>, vector<8x16x8xf32>
    tpu.vector_store %arg3[%c0_4, %c0_5, %c0_6], %3 {strides = array<i32>} : memref<8x16x8xf32, #tpu.memory_space<vmem>>, vector<8x16x8xf32>,
    %c0_7 = arith.constant 0 : index
    %c0_8 = arith.constant 0 : index
    %c0_9 = arith.constant 0 : index
    %5 = tpu.strided_load %arg3[%c0_7, %c0_8, %c0_9] {strides = array<i32: 1, 2, 1>} : memref<8x16x8xf32, #tpu.memory_space<vmem>>, vector<8x8x8xf32>
    %c0_10 = arith.constant 0 : index
    %c1_11 = arith.constant 1 : index
    %c0_12 = arith.constant 0 : index
    %6 = tpu.strided_load %arg3[%c0_10, %c1_11, %c0_12] {strides = array<i32: 1, 2, 1>} : memref<8x16x8xf32, #tpu.memory_space<vmem>>, vector<8x8x8xf32>
    %7 = arith.maximumf %5, %6 : vector<8x8x8xf32>
    %8 = tpu.transpose %7, [0, 2, 1] : vector<8x8x8xf32> -> vector<8x8x8xf32>
    %c0_13 = arith.constant 0 : index
    %c0_14 = arith.constant 0 : index
    %c0_15 = arith.constant 0 : index
    %9 = vector.load %arg2[%c0_13, %c0_14, %c0_15] : memref<8x8x8xf32, #tpu.memory_space<vmem>>, vector<8x8x8xf32>
    tpu.vector_store %arg2[%c0_13, %c0_14, %c0_15], %8 {strides = array<i32>} : memref<8x8x8xf32, #tpu.memory_space<vmem>>, vector<8x8x8xf32>,
    return
  }
  func.func @transform_0(%arg0: i32) -> (i32, i32, i32) {
    %c0_i32 = arith.constant 0 : i32
    %c0_i32_0 = arith.constant 0 : i32
    %c0_i32_1 = arith.constant 0 : i32
    return %arg0, %c0_i32, %c0_i32_0 : i32, i32, i32
  }
  func.func @transform_1(%arg0: i32) -> (i32, i32, i32) {
    %c0_i32 = arith.constant 0 : i32
    %c0_i32_0 = arith.constant 0 : i32
    %c0_i32_1 = arith.constant 0 : i32
    return %arg0, %c0_i32, %c0_i32_0 : i32, i32, i32
  }
}

</mosaic_0001>

<bundles_post_ra>
// kernel: tpu_custom_call.1
= control target key start
LH: loop header
LB: loop body
LE: loop exit
PB: predicated region body
PF: predicated region fallthrough
CT: control target
= control target key end

     0   :  { %6 = vsyncpa [#allocation4], 0  ;;  %s754_s0 = inlined_call_operand.hbm [shape: f32[8,16,16], index: 0, kind: input, shape index: {}]   ;;  %s755_s1 = inlined_call_operand.hbm [shape: f32[8,8,8], index: 1, kind: output, shape index: {}]  }
   0x1   :  { %7 = vsyncpa [#allocation5], 0  ;;  %s704_s6 = smov [#allocation3]  }
   0x2   :  { %s13_s7 = sshll.u32 %s704_s6, 4  ;;  %s14_s7 = int_to_ptr.vmem [resolvable:$true] %s13_s7 }
   0x3   :  { %s668_s8 = scalar_lea.vmem %s14_s7, 2048  ;;  %p673_p1 = scmp.lt.s32.totalorder %s14_s7, %s14_s7 }
   0x4   :  { %p669_p0 = scmp.ne.s32.totalorder %s14_s7, %s668_s8  ;;  %p674_p2 = scmp.lt.s32.totalorder %s668_s8, %s668_s8 }
   0x6   :  { %p675_p3 = por %p674_p2, %p673_p1 }
   0x8   :  { %p676_p4 = pnand %p675_p3, %p669_p0 }
   0xa   :  { %679 = shalt.err (!%p676_p4)
}
   0xb   :  { %s705_s9 = smov 128   ;;  %s706_s10 = smov 8  }
   0xc   :  { %19 = dma.hbm_to_vmem [thread:$0]  %s754_s0, 2048, %s14_s7, [#allocation4], %s705_s9, %s705_s9, %s706_s10  }
   0xd   :  { %700 = dma.done.wait [#allocation4], 2048  }
   0xe   :  { %701 = vsyncadd [#allocation4], 4294965248  ;;  %v27_v0 = vld [vmem:[#allocation3 + $0x20] ss:$2 sm:$0xff]  ;;  %v43_v1 = vld [vmem:[#allocation3 + $0x21] ss:$2 sm:$0xff] }
   0xf   :  { %v23_v2 = vld [vmem:[#allocation3] ss:$2 sm:$0xff]  ;;  %v56_v3 = vmax.f32 %v27_v0, %v43_v1  ;;  %v39_v4 = vld [vmem:[#allocation3 + $0x1] ss:$2 sm:$0xff]  ;;  %v29_v5 = vld [vmem:[#allocation3 + $0x30] ss:$2 sm:$0xff] }
  0x10   :  { %v45_v6 = vld [vmem:[#allocation3 + $0x31] ss:$2 sm:$0xff]  ;;  %v54_v7 = vmax.f32 %v23_v2, %v39_v4  ;;  %v25_v8 = vld [vmem:[#allocation3 + $0x10] ss:$2 sm:$0xff]  ;;  %v31_v14 = vld [vmem:[#allocation3 + $0x40] ss:$2 sm:$0xff] }
  0x11   :  { %v41_v9 = vld [vmem:[#allocation3 + $0x11] ss:$2 sm:$0xff]  ;;  %126 = vxpose.xlu1.b32.start.end [1/1] (short) (narrow) %v56_v3, 16  ;;  %v57_v10 = vmax.f32 %v29_v5, %v45_v6  ;;  %v33_v12 = vld [vmem:[#allocation3 + $0x50] ss:$2 sm:$0xff]  ;;  %vm318_vm0 = vcmask 64512  }
  0x12   :  { %62 = vxpose.xlu0.b32.start.end [1/1] (short) (narrow) %v54_v7, 16  ;;  %v55_v11 = vmax.f32 %v25_v8, %v41_v9  ;;  %v49_v13 = vld [vmem:[#allocation3 + $0x51] ss:$2 sm:$0xff]  ;;  %v47_v15 = vld [vmem:[#allocation3 + $0x41] ss:$2 sm:$0xff]  ;;  %s707_s0 = smov [#allocation6]  }
  0x13   :  { %v59_v16 = vmax.f32 %v33_v12, %v49_v13  ;;  %v58_v17 = vmax.f32 %v31_v14, %v47_v15  ;;  %v37_v18 = vld [vmem:[#allocation3 + $0x70] ss:$2 sm:$0xff]  ;;  %v53_v19 = vld [vmem:[#allocation3 + $0x71] ss:$2 sm:$0xff]  ;;  %v35_v20 = vld [vmem:[#allocation3 + $0x60] ss:$2 sm:$0xff] }
  0x14   :  { %v51_v21 = vld [vmem:[#allocation3 + $0x61] ss:$2 sm:$0xff]  ;;  %v61_v22 = vmax.f32 %v37_v18, %v53_v19  ;;  %s643_s13 = sshll.u32 %s707_s0, 4  ;;  %s644_s13 = int_to_ptr.vmem [resolvable:$true] %s643_s13 }
  0x15   :  { %v60_v23 = vmax.f32 %v35_v20, %v51_v21  ;;  %s680_s14 = scalar_lea.vmem %s644_s13, 1024  ;;  %p685_p6 = scmp.lt.s32.totalorder %s644_s13, %s644_s13 }
  0x16   :  { %158 = vxpose.xlu1.b32.start.end [1/1] (short) (narrow) %v57_v10, 16  ;;  %p681_p5 = scmp.ne.s32.totalorder %s644_s13, %s680_s14  ;;  %p686_p7 = scmp.lt.s32.totalorder %s680_s14, %s680_s14 }
  0x17   :  { %94 = vxpose.xlu0.b32.start.end [1/1] (short) (narrow) %v55_v11, 16 }
  0x18   :  { %p687_p8 = por %p686_p7, %p685_p6 }
  0x1a   :  { %p688_p9 = pnand %p687_p8, %p681_p5 }
  0x1b   :  { %222 = vxpose.xlu1.b32.start.end [1/1] (short) (narrow) %v59_v16, 16 }
  0x1c   :  { %190 = vxpose.xlu0.b32.start.end [1/1] (short) (narrow) %v58_v17, 16 }
  0x20   :  { %286 = vxpose.xlu1.b32.start.end [1/1] (short) (narrow) %v61_v22, 16 }
  0x21   :  { %254 = vxpose.xlu0.b32.start.end [1/1] (short) (narrow) %v60_v23, 16 }
  0x8d   :  { %v142_v24 = vpop.trf.xlu1 }
  0x8e   :  { %323 = vst.msk [vmem:[#allocation2 + $0x20] sm:$0xff] %vm318_vm0, %v142_v24  ;;  %v78_v25 = vpop.trf.xlu0 }
  0x8f   :  { %319 = vst.msk [vmem:[#allocation2] sm:$0xff] %vm318_vm0, %v78_v25 }
  0x91   :  { %v143_v26 = vpop.trf.xlu1 }
  0x92   :  { %324 = vst.msk [vmem:[#allocation2 + $0x28] sm:$0xff] %vm318_vm0, %v143_v26  ;;  %v79_v27 = vpop.trf.xlu0 }
  0x93   :  { %320 = vst.msk [vmem:[#allocation2 + $0x8] sm:$0xff] %vm318_vm0, %v79_v27 }
  0x95   :  { %v174_v28 = vpop.trf.xlu1 }
  0x96   :  { %325 = vst.msk [vmem:[#allocation2 + $0x30] sm:$0xff] %vm318_vm0, %v174_v28  ;;  %v110_v29 = vpop.trf.xlu0 }
  0x97   :  { %321 = vst.msk [vmem:[#allocation2 + $0x10] sm:$0xff] %vm318_vm0, %v110_v29 }
  0x99   :  { %v175_v30 = vpop.trf.xlu1  ;;  %v339_v35 = vld [vmem:[#allocation2 + $0x20] ss:$2 sm:$0xff]  ;;  %v355_v36 = vld [vmem:[#allocation2 + $0x21] ss:$2 sm:$0xff] }
  0x9a   :  { %326 = vst.msk [vmem:[#allocation2 + $0x38] sm:$0xff] %vm318_vm0, %v175_v30  ;;  %v111_v31 = vpop.trf.xlu0  ;;  %v335_v32 = vld [vmem:[#allocation2] ss:$2 sm:$0xff]  ;;  %v351_v33 = vld [vmem:[#allocation2 + $0x1] ss:$2 sm:$0xff]  ;;  %v368_v39 = vmax.f32 %v339_v35, %v355_v36 }
  0x9b   :  { %322 = vst.msk [vmem:[#allocation2 + $0x18] sm:$0xff] %vm318_vm0, %v111_v31  ;;  %v366_v34 = vmax.f32 %v335_v32, %v351_v33 }
  0x9d   :  { %374 = vxpose.xlu0.b32.start.end [1/1] (short) (narrow) %v366_v34, 8  ;;  %v238_v37 = vpop.trf.xlu1 }
  0x9e   :  { %329 = vst.msk [vmem:[#allocation2 + $0x50] sm:$0xff] %vm318_vm0, %v238_v37  ;;  %v206_v38 = vpop.trf.xlu0 }
  0x9f   :  { %327 = vst.msk [vmem:[#allocation2 + $0x40] sm:$0xff] %vm318_vm0, %v206_v38 }
  0xa1   :  { %438 = vxpose.xlu0.b32.start.end [1/1] (short) (narrow) %v368_v39, 8  ;;  %v239_v40 = vpop.trf.xlu1  ;;  %v341_v45 = vld [vmem:[#allocation2 + $0x30] ss:$2 sm:$0xff]  ;;  %v357_v46 = vld [vmem:[#allocation2 + $0x31] ss:$2 sm:$0xff] }
  0xa2   :  { %330 = vst.msk [vmem:[#allocation2 + $0x58] sm:$0xff] %vm318_vm0, %v239_v40  ;;  %v207_v41 = vpop.trf.xlu0  ;;  %v337_v42 = vld [vmem:[#allocation2 + $0x10] ss:$2 sm:$0xff]  ;;  %v353_v43 = vld [vmem:[#allocation2 + $0x11] ss:$2 sm:$0xff]  ;;  %v369_v49 = vmax.f32 %v341_v45, %v357_v46 }
  0xa3   :  { %328 = vst.msk [vmem:[#allocation2 + $0x48] sm:$0xff] %vm318_vm0, %v207_v41  ;;  %v367_v44 = vmax.f32 %v337_v42, %v353_v43 }
  0xa5   :  { %406 = vxpose.xlu1.b32.start.end [1/1] (short) (narrow) %v367_v44, 8  ;;  %v302_v47 = vpop.trf.xlu1 }
  0xa6   :  { %333 = vst.msk [vmem:[#allocation2 + $0x70] sm:$0xff] %vm318_vm0, %v302_v47  ;;  %v270_v48 = vpop.trf.xlu0 }
  0xa7   :  { %331 = vst.msk [vmem:[#allocation2 + $0x60] sm:$0xff] %vm318_vm0, %v270_v48 }
  0xa9   :  { %470 = vxpose.xlu1.b32.start.end [1/1] (short) (narrow) %v369_v49, 8  ;;  %v303_v50 = vpop.trf.xlu1  ;;  %v345_v51 = vld [vmem:[#allocation2 + $0x50] ss:$2 sm:$0xff]  ;;  %v361_v52 = vld [vmem:[#allocation2 + $0x51] ss:$2 sm:$0xff] }
  0xaa   :  { %334 = vst.msk [vmem:[#allocation2 + $0x78] sm:$0xff] %vm318_vm0, %v303_v50  ;;  %v271_v53 = vpop.trf.xlu0  ;;  %v371_v54 = vmax.f32 %v345_v51, %v361_v52  ;;  %v343_v55 = vld [vmem:[#allocation2 + $0x40] ss:$2 sm:$0xff]  ;;  %v359_v56 = vld [vmem:[#allocation2 + $0x41] ss:$2 sm:$0xff] }
  0xab   :  { %332 = vst.msk [vmem:[#allocation2 + $0x68] sm:$0xff] %vm318_vm0, %v271_v53  ;;  %v370_v57 = vmax.f32 %v343_v55, %v359_v56 }
  0xad   :  { %534 = vxpose.xlu1.b32.start.end [1/1] (short) (narrow) %v371_v54, 8  ;;  %502 = vxpose.xlu0.b32.start.end [1/1] (short) (narrow) %v370_v57, 8 }
  0xb1   :  { %v349_v58 = vld [vmem:[#allocation2 + $0x70] ss:$2 sm:$0xff]  ;;  %v365_v59 = vld [vmem:[#allocation2 + $0x71] ss:$2 sm:$0xff] }
  0xb2   :  { %v373_v60 = vmax.f32 %v349_v58, %v365_v59  ;;  %v347_v61 = vld [vmem:[#allocation2 + $0x60] ss:$2 sm:$0xff]  ;;  %v363_v62 = vld [vmem:[#allocation2 + $0x61] ss:$2 sm:$0xff] }
  0xb3   :  { %v372_v63 = vmax.f32 %v347_v61, %v363_v62 }
  0xb4   :  { %598 = vxpose.xlu1.b32.start.end [1/1] (short) (narrow) %v373_v60, 8 }
  0xb5   :  { %566 = vxpose.xlu0.b32.start.end [1/1] (short) (narrow) %v372_v63, 8 }
 0x119   :  { %v390_v0 = vpop.trf.xlu0 }
 0x11a   :  { %630 = vst.msk [vmem:[#allocation6] sm:$0xff] %vm318_vm0, %v390_v0 }
 0x11d   :  { %v454_v1 = vpop.trf.xlu0 }
 0x11e   :  { %632 = vst.msk [vmem:[#allocation6 + $0x10] sm:$0xff] %vm318_vm0, %v454_v1 }
 0x121   :  { %v422_v2 = vpop.trf.xlu1 }
 0x122   :  { %631 = vst.msk [vmem:[#allocation6 + $0x8] sm:$0xff] %vm318_vm0, %v422_v2 }
 0x125   :  { %v486_v3 = vpop.trf.xlu1 }
 0x126   :  { %633 = vst.msk [vmem:[#allocation6 + $0x18] sm:$0xff] %vm318_vm0, %v486_v3 }
 0x129   :  { %v550_v4 = vpop.trf.xlu1  ;;  %v518_v5 = vpop.trf.xlu0 }
 0x12a   :  { %635 = vst.msk [vmem:[#allocation6 + $0x28] sm:$0xff] %vm318_vm0, %v550_v4  ;;  %634 = vst.msk [vmem:[#allocation6 + $0x20] sm:$0xff] %vm318_vm0, %v518_v5 }
 0x130   :  { %v614_v6 = vpop.trf.xlu1 }
 0x131   :  { %637 = vst.msk [vmem:[#allocation6 + $0x38] sm:$0xff] %vm318_vm0, %v614_v6  ;;  %v582_v7 = vpop.trf.xlu0 }
 0x132   :  { %636 = vst.msk [vmem:[#allocation6 + $0x30] sm:$0xff] %vm318_vm0, %v582_v7 }
 0x133   :  { %691 = shalt.err (!%p688_p9)
}
 0x134   :  { %649 = dma.vmem_to_hbm [thread:$0]  %s644_s13, 1024, %s755_s1, [#allocation5], %s705_s9, %s705_s9, %s706_s10  }
 0x135   :  { %702 = dma.done.wait [#allocation5], 1024  }
 0x136   :  { %703 = vsyncadd [#allocation5], 4294966272 }
 0x137   :  { %653 = vsyncpa [#allocation4], 1 }
 0x138   :  { %654 = vsyncpa [#allocation5], 1 }

</bundles_post_ra>
